<compile_context>
chip_gen: v6e
topology: v6e:2x2x1
jax: 0.10.0
libtpu: 0.0.40
codegen_flags: <defaults>
</compile_context>

<pallas_src>
import math

import jax
import jax.numpy as jnp
from jax.experimental import pallas as pl
from jax.experimental.pallas import tpu as pltpu


# --------------------------------------------------------------------------- #
# Kernels
# --------------------------------------------------------------------------- #
def _noisy_train_kernel(x_ref, wmu_ref, wsig_ref, eps_in_ref, eps_out_ref,
                        bmu_ref, bsig_ref, o_ref):
    """Training tile: y = x @ mu + eps_out * ((x * eps_in) @ sigma) + (bmu + bsig*eps_out).

    Weights arrive pre-transposed as (tk, tn) tiles; o_ref is the f32 accumulator
    (output block is VMEM-resident across the trailing reduction axis k)."""
    k = pl.program_id(2)

    @pl.when(k == 0)
    def _():
        o_ref[...] = jnp.zeros_like(o_ref)

    x = x_ref[...]                                                  # (tb, tk)

    # mu path: bf16 weight tile goes DMA -> MXU untouched.
    part_mu = jnp.dot(x, wmu_ref[...], preferred_element_type=jnp.float32)

    # sigma path (algebraic rewrite of sigma * outer(eps_out, eps_in)):
    # eps_in multiply kept in f32 (no bf16 VPU on v5e), then cast back for the MXU.
    x_eps = (x.astype(jnp.float32) * eps_in_ref[...]).astype(x.dtype)
    part_sig = jnp.dot(x_eps, wsig_ref[...], preferred_element_type=jnp.float32)

    o_ref[...] += part_mu + eps_out_ref[...] * part_sig

    @pl.when(k == pl.num_programs(2) - 1)
    def _():
        o_ref[...] += bmu_ref[...] + bsig_ref[...] * eps_out_ref[...]


def _noisy_eval_kernel(x_ref, wmu_ref, bmu_ref, o_ref):
    """Eval tile: y = x @ mu + bias_mu (sigma / epsilon never DMA'd)."""
    k = pl.program_id(2)

    @pl.when(k == 0)
    def _():
        o_ref[...] = jnp.zeros_like(o_ref)

    o_ref[...] += jnp.dot(x_ref[...], wmu_ref[...],
                          preferred_element_type=jnp.float32)

    @pl.when(k == pl.num_programs(2) - 1)
    def _():
        o_ref[...] += bmu_ref[...]


# --------------------------------------------------------------------------- #
# Tiling helpers
# --------------------------------------------------------------------------- #
def _round_up(v, m):
    return (v + m - 1) // m * m


def _pad_dim_and_tile(dim):
    """Pad a feature dim to a lane-friendly size and pick the largest dividing tile.

    Opportunistically pads up to the next multiple of 512 when the extra padding
    is <= 12.5% (fewer grid steps, fuller-lane tiles) instead of falling back to
    many 128-wide steps."""
    dim_p = _round_up(dim, 128)
    cand = _round_up(dim_p, 512)
    if cand != dim_p and (cand - dim_p) * 8 <= dim_p:
        dim_p = cand
    for t in (1024, 512, 256, 128):
        if dim_p % t == 0:
            return dim_p, t
    return dim_p, 128  # unreachable: dim_p is a multiple of 128


# --------------------------------------------------------------------------- #
# One-time parameter preparation (padding / transpose / cast done ONCE, not per call)
# --------------------------------------------------------------------------- #
def prepare_noisy_linear_params(params, *, compute_dtype=jnp.bfloat16):
    wmu = params["weight_mu"]
    wsig = params["weight_sigma"]
    Out, In = wmu.shape

    In_p, tk = _pad_dim_and_tile(In)
    Out_p, tn = _pad_dim_and_tile(Out)
    # v7x has 2 TensorCores: make sure the parallel output-tile axis has >= 2 blocks.
    while Out_p // tn < 2 and tn > 128:
        tn //= 2

    def pad2(a, rows, cols):
        return jnp.pad(a, ((0, rows - a.shape[0]), (0, cols - a.shape[1])))

    # Transposed (In, Out) layout: kernel contracts (tb,tk) @ (tk,tn), no RHS transpose.
    wmu_t = pad2(wmu.T, In_p, Out_p).astype(compute_dtype)
    wsig_t = pad2(wsig.T, In_p, Out_p).astype(compute_dtype)

    bmu_row = pad2(params["bias_mu"].reshape(1, Out), 1, Out_p).astype(jnp.float32)
    bsig_row = pad2(params["bias_sigma"].reshape(1, Out), 1, Out_p).astype(jnp.float32)
    eps_in_row = pad2(params["eps_in"].reshape(1, In), 1, In_p).astype(jnp.float32)
    eps_out_row = pad2(params["eps_out"].reshape(1, Out), 1, Out_p).astype(jnp.float32)

    return dict(
        wmu_t=wmu_t, wsig_t=wsig_t,
        bmu_row=bmu_row, bsig_row=bsig_row,
        eps_in_row=eps_in_row, eps_out_row=eps_out_row,
        in_features=In, out_features=Out,
        In_p=In_p, Out_p=Out_p, tk=tk, tn=tn,
        compute_dtype=compute_dtype,
    )


# --------------------------------------------------------------------------- #
# Forward
# --------------------------------------------------------------------------- #
def noisy_linear_forward(x, prepared, *, training=True):
    """NoisyLinear forward.  x: [B, in_features].  `prepared` from prepare_noisy_linear_params."""
    In = prepared["in_features"]
    Out = prepared["out_features"]
    In_p, Out_p = prepared["In_p"], prepared["Out_p"]
    tk, tn = prepared["tk"], prepared["tn"]
    cdt = prepared["compute_dtype"]

    B = x.shape[0]
    assert x.shape[1] == In

    B_p = _round_up(B, 16)                 # 16 for bf16 sublane packing
    tb = B_p if B_p <= 128 else 128        # tile the batch: bounded VMEM, more parallel work
    B_p = _round_up(B_p, tb)

    x_p = jnp.pad(x, ((0, B_p - B), (0, In_p - In))).astype(cdt)

    grid = (B_p // tb, Out_p // tn, In_p // tk)   # reduction axis (In) last

    x_spec = pl.BlockSpec((tb, tk), lambda i, j, k: (i, k))
    w_spec = pl.BlockSpec((tk, tn), lambda i, j, k: (k, j))
    irow_spec = pl.BlockSpec((1, tk), lambda i, j, k: (0, k))
    orow_spec = pl.BlockSpec((1, tn), lambda i, j, k: (0, j))
    out_spec = pl.BlockSpec((tb, tn), lambda i, j, k: (i, j))

    out_shape = jax.ShapeDtypeStruct((B_p, Out_p), jnp.float32)
    compiler_params = pltpu.CompilerParams(
        dimension_semantics=("parallel", "parallel", "arbitrary"),
        vmem_limit_bytes=48 * 1024 * 1024,   # headroom vs v7x's 64 MiB physical VMEM
    )

    n_j = Out_p // tn
    wbytes = jnp.dtype(cdt).itemsize

    if training:
        cost = pl.CostEstimate(
            flops=4 * B_p * In_p * Out_p,          # two matmuls
            transcendentals=0,
            bytes_accessed=(2 * In_p * Out_p * wbytes          # mu + sigma streamed once
                            + B_p * In_p * wbytes * n_j        # x re-streamed per output tile
                            + B_p * Out_p * 4                  # output
                            + (In_p + 3 * Out_p) * 4))         # eps / biases
        out = pl.pallas_call(
            _noisy_train_kernel,
            out_shape=out_shape,
            grid_spec=pltpu.PrefetchScalarGridSpec(
                num_scalar_prefetch=0,
                grid=grid,
                in_specs=[x_spec, w_spec, w_spec, irow_spec, orow_spec,
                          orow_spec, orow_spec],
                out_specs=out_spec),
            compiler_params=compiler_params,
            cost_estimate=cost,
        )(x_p, prepared["wmu_t"], prepared["wsig_t"],
          prepared["eps_in_row"], prepared["eps_out_row"],
          prepared["bmu_row"], prepared["bsig_row"])
    else:
        cost = pl.CostEstimate(
            flops=2 * B_p * In_p * Out_p,
            transcendentals=0,
            bytes_accessed=(In_p * Out_p * wbytes
                            + B_p * In_p * wbytes * n_j
                            + B_p * Out_p * 4
                            + Out_p * 4))
        out = pl.pallas_call(
            _noisy_eval_kernel,
            out_shape=out_shape,
            grid_spec=pltpu.PrefetchScalarGridSpec(
                num_scalar_prefetch=0,
                grid=grid,
                in_specs=[x_spec, w_spec, orow_spec],
                out_specs=out_spec),
            compiler_params=compiler_params,
            cost_estimate=cost,
        )(x_p, prepared["wmu_t"], prepared["bmu_row"])

    return out[:B, :Out].astype(x.dtype)


# --------------------------------------------------------------------------- #
# Parameter / noise init (mirrors reset_parameters() + reset_noise())
# --------------------------------------------------------------------------- #
def _scale_noise(key, size):
    # PyTorch: x = randn(size); sign(x) * sqrt(|x|)
    x = jax.random.normal(key, (size,), dtype=jnp.float32)
    return jnp.sign(x) * jnp.sqrt(jnp.abs(x))


def init_noisy_linear_params(key, in_features, out_features, std_init=0.5):
    """Noise kept FACTORIZED (eps_in, eps_out); weight_epsilon = outer(eps_out, eps_in)."""
    k_wmu, k_bmu, k_ein, k_eout = jax.random.split(key, 4)
    mu_range = 1.0 / math.sqrt(in_features)

    weight_mu = jax.random.uniform(
        k_wmu, (out_features, in_features),
        minval=-mu_range, maxval=mu_range, dtype=jnp.float32)
    weight_sigma = jnp.full((out_features, in_features),
                            std_init / math.sqrt(in_features), jnp.float32)
    bias_mu = jax.random.uniform(
        k_bmu, (out_features,),
        minval=-mu_range, maxval=mu_range, dtype=jnp.float32)
    bias_sigma = jnp.full((out_features,),
                          std_init / math.sqrt(out_features), jnp.float32)

    eps_in = _scale_noise(k_ein, in_features)
    eps_out = _scale_noise(k_eout, out_features)

    return dict(weight_mu=weight_mu, weight_sigma=weight_sigma,
                bias_mu=bias_mu, bias_sigma=bias_sigma,
                eps_in=eps_in, eps_out=eps_out)


def _reference(x, p, training=True):
    if training:
        w_eps = jnp.outer(p["eps_out"], p["eps_in"])   # eps_out.ger(eps_in)
        w = p["weight_mu"] + p["weight_sigma"] * w_eps
        b = p["bias_mu"] + p["bias_sigma"] * p["eps_out"]
    else:
        w = p["weight_mu"]
        b = p["bias_mu"]
    return x @ w.T + b


# --------------------------------------------------------------------------- #
# Demo / self-test
# --------------------------------------------------------------------------- #
if __name__ == "__main__":
    key = jax.random.PRNGKey(0)
    k_param, k_x = jax.random.split(key)

    in_features, out_features = 32, 64
    batch = 8

    params = init_noisy_linear_params(k_param, in_features, out_features,
                                      std_init=0.5)
    # One-time pad / transpose / bf16 cast (no per-call weight copies).
    prepared = prepare_noisy_linear_params(params, compute_dtype=jnp.bfloat16)

    x = jax.random.normal(k_x, (batch, in_features), dtype=jnp.float32)

    # Training-mode forward (noise applied via the two-matmul algebraic rewrite).
    y_train = jax.block_until_ready(
        noisy_linear_forward(x, prepared, training=True))

    # Eval-mode forward (mu-only kernel; sigma / epsilon never DMA'd).
    y_eval = jax.block_until_ready(
        noisy_linear_forward(x, prepared, training=False))

    ref_train = _reference(x, params, training=True)
    ref_eval = _reference(x, params, training=False)

    assert y_train.shape == (batch, out_features)
    assert y_eval.shape == (batch, out_features)
    # bf16 compute path vs f32 reference -> looser tolerance.
    assert jnp.allclose(y_train, ref_train, atol=5e-2, rtol=5e-2)
    assert jnp.allclose(y_eval, ref_eval, atol=5e-2, rtol=5e-2)

    print("KERNEL_OK")
</pallas_src>

<mosaic_0001>
module attributes {stable_mosaic.version = 11 : i64} {
  func.func @_noisy_train_kernel(%arg0: i32, %arg1: i32, %arg2: i32, %arg3: memref<16x128xbf16, #tpu.memory_space<vmem>>, %arg4: memref<128x128xbf16, #tpu.memory_space<vmem>>, %arg5: memref<128x128xbf16, #tpu.memory_space<vmem>>, %arg6: memref<1x128xf32, #tpu.memory_space<vmem>>, %arg7: memref<1x128xf32, #tpu.memory_space<vmem>>, %arg8: memref<1x128xf32, #tpu.memory_space<vmem>>, %arg9: memref<1x128xf32, #tpu.memory_space<vmem>>, %arg10: memref<16x128xf32, #tpu.memory_space<vmem>>) attributes {dimension_semantics = [#tpu.dimension_semantics<parallel>, #tpu.dimension_semantics<parallel>, #tpu.dimension_semantics<arbitrary>], iteration_bounds = array<i64: 1, 1, 1>, scalar_prefetch = 0 : i64, scratch_operands = 0 : i64, tpu.core_type = #tpu.core_type<tc>, window_params = [{transform_indices = @transform_0, window_bounds = array<i64: 16, 128>}, {transform_indices = @transform_1, window_bounds = array<i64: 128, 128>}, {transform_indices = @transform_2, window_bounds = array<i64: 128, 128>}, {transform_indices = @transform_3, window_bounds = array<i64: 1, 128>}, {transform_indices = @transform_4, window_bounds = array<i64: 1, 128>}, {transform_indices = @transform_5, window_bounds = array<i64: 1, 128>}, {transform_indices = @transform_6, window_bounds = array<i64: 1, 128>}, {transform_indices = @transform_7, window_bounds = array<i64: 16, 128>}]} {
    %c0_i32 = arith.constant 0 : i32
    %0 = arith.cmpi eq, %arg2, %c0_i32 : i32
    %1 = arith.extui %0 : i1 to i32
    %c0_i32_0 = arith.constant 0 : i32
    %2 = arith.cmpi ne, %1, %c0_i32_0 : i32
    scf.if %2 {
      %cst_17 = arith.constant 0.000000e+00 : f32
      %23 = vector.broadcast %cst_17 : f32 to vector<16x128xf32>
      %c0_18 = arith.constant 0 : index
      %c0_19 = arith.constant 0 : index
      %24 = vector.load %arg10[%c0_18, %c0_19] : memref<16x128xf32, #tpu.memory_space<vmem>>, vector<16x128xf32>
      tpu.vector_store %arg10[%c0_18, %c0_19], %23 {strides = array<i32>} : memref<16x128xf32, #tpu.memory_space<vmem>>, vector<16x128xf32>,
    } else {
    }
    %c0 = arith.constant 0 : index
    %c0_1 = arith.constant 0 : index
    %3 = vector.load %arg3[%c0, %c0_1] : memref<16x128xbf16, #tpu.memory_space<vmem>>, vector<16x128xbf16>
    %c0_2 = arith.constant 0 : index
    %c0_3 = arith.constant 0 : index
    %4 = vector.load %arg4[%c0_2, %c0_3] : memref<128x128xbf16, #tpu.memory_space<vmem>>, vector<128x128xbf16>
    %cst = arith.constant dense<0.000000e+00> : vector<16x128xf32>
    %5 = tpu.matmul %3, %4, %cst {dimension_numbers = #tpu.dot_dimension_numbers<[1], [0], [0], [1], [0, 0, 1, 1], [], []>} : vector<16x128xbf16>, vector<128x128xbf16>, vector<16x128xf32> -> vector<16x128xf32>
    %6 = arith.extf %3 : vector<16x128xbf16> to vector<16x128xf32>
    %c0_4 = arith.constant 0 : index
    %c0_5 = arith.constant 0 : index
    %7 = vector.load %arg6[%c0_4, %c0_5] : memref<1x128xf32, #tpu.memory_space<vmem>>, vector<1x128xf32>
    %8 = vector.broadcast %7 : vector<1x128xf32> to vector<16x128xf32>
    %9 = arith.mulf %6, %8 : vector<16x128xf32>
    %10 = arith.truncf %9 : vector<16x128xf32> to vector<16x128xbf16>
    %c0_6 = arith.constant 0 : index
    %c0_7 = arith.constant 0 : index
    %11 = vector.load %arg5[%c0_6, %c0_7] : memref<128x128xbf16, #tpu.memory_space<vmem>>, vector<128x128xbf16>
    %cst_8 = arith.constant dense<0.000000e+00> : vector<16x128xf32>
    %12 = tpu.matmul %10, %11, %cst_8 {dimension_numbers = #tpu.dot_dimension_numbers<[1], [0], [0], [1], [0, 0, 1, 1], [], []>} : vector<16x128xbf16>, vector<128x128xbf16>, vector<16x128xf32> -> vector<16x128xf32>
    %c0_9 = arith.constant 0 : index
    %c0_10 = arith.constant 0 : index
    %13 = vector.load %arg10[%c0_9, %c0_10] : memref<16x128xf32, #tpu.memory_space<vmem>>, vector<16x128xf32>
    %c0_11 = arith.constant 0 : index
    %c0_12 = arith.constant 0 : index
    %14 = vector.load %arg7[%c0_11, %c0_12] : memref<1x128xf32, #tpu.memory_space<vmem>>, vector<1x128xf32>
    %15 = vector.broadcast %14 : vector<1x128xf32> to vector<16x128xf32>
    %16 = arith.mulf %15, %12 : vector<16x128xf32>
    %17 = arith.addf %5, %16 : vector<16x128xf32>
    %18 = arith.addf %13, %17 : vector<16x128xf32>
    %c0_13 = arith.constant 0 : index
    %c0_14 = arith.constant 0 : index
    %19 = vector.load %arg10[%c0_13, %c0_14] : memref<16x128xf32, #tpu.memory_space<vmem>>, vector<16x128xf32>
    tpu.vector_store %arg10[%c0_13, %c0_14], %18 {strides = array<i32>} : memref<16x128xf32, #tpu.memory_space<vmem>>, vector<16x128xf32>,
    %c0_i32_15 = arith.constant 0 : i32
    %20 = arith.cmpi eq, %arg2, %c0_i32_15 : i32
    %21 = arith.extui %20 : i1 to i32
    %c0_i32_16 = arith.constant 0 : i32
    %22 = arith.cmpi ne, %21, %c0_i32_16 : i32
    scf.if %22 {
      %c0_17 = arith.constant 0 : index
      %c0_18 = arith.constant 0 : index
      %23 = vector.load %arg10[%c0_17, %c0_18] : memref<16x128xf32, #tpu.memory_space<vmem>>, vector<16x128xf32>
      %c0_19 = arith.constant 0 : index
      %c0_20 = arith.constant 0 : index
      %24 = vector.load %arg8[%c0_19, %c0_20] : memref<1x128xf32, #tpu.memory_space<vmem>>, vector<1x128xf32>
      %c0_21 = arith.constant 0 : index
      %c0_22 = arith.constant 0 : index
      %25 = vector.load %arg9[%c0_21, %c0_22] : memref<1x128xf32, #tpu.memory_space<vmem>>, vector<1x128xf32>
      %c0_23 = arith.constant 0 : index
      %c0_24 = arith.constant 0 : index
      %26 = vector.load %arg7[%c0_23, %c0_24] : memref<1x128xf32, #tpu.memory_space<vmem>>, vector<1x128xf32>
      %27 = arith.mulf %25, %26 : vector<1x128xf32>
      %28 = arith.addf %24, %27 : vector<1x128xf32>
      %29 = vector.broadcast %28 : vector<1x128xf32> to vector<16x128xf32>
      %30 = arith.addf %23, %29 : vector<16x128xf32>
      %c0_25 = arith.constant 0 : index
      %c0_26 = arith.constant 0 : index
      %31 = vector.load %arg10[%c0_25, %c0_26] : memref<16x128xf32, #tpu.memory_space<vmem>>, vector<16x128xf32>
      tpu.vector_store %arg10[%c0_25, %c0_26], %30 {strides = array<i32>} : memref<16x128xf32, #tpu.memory_space<vmem>>, vector<16x128xf32>,
    } else {
    }
    return
  }
  func.func @transform_0(%arg0: i32, %arg1: i32, %arg2: i32) -> (i32, i32) {
    %c0_i32 = arith.constant 0 : i32
    return %arg0, %arg2 : i32, i32
  }
  func.func @transform_1(%arg0: i32, %arg1: i32, %arg2: i32) -> (i32, i32) {
    %c0_i32 = arith.constant 0 : i32
    return %arg2, %arg1 : i32, i32
  }
  func.func @transform_2(%arg0: i32, %arg1: i32, %arg2: i32) -> (i32, i32) {
    %c0_i32 = arith.constant 0 : i32
    return %arg2, %arg1 : i32, i32
  }
  func.func @transform_3(%arg0: i32, %arg1: i32, %arg2: i32) -> (i32, i32) {
    %c0_i32 = arith.constant 0 : i32
    %c0_i32_0 = arith.constant 0 : i32
    return %c0_i32, %arg2 : i32, i32
  }
  func.func @transform_4(%arg0: i32, %arg1: i32, %arg2: i32) -> (i32, i32) {
    %c0_i32 = arith.constant 0 : i32
    %c0_i32_0 = arith.constant 0 : i32
    return %c0_i32, %arg1 : i32, i32
  }
  func.func @transform_5(%arg0: i32, %arg1: i32, %arg2: i32) -> (i32, i32) {
    %c0_i32 = arith.constant 0 : i32
    %c0_i32_0 = arith.constant 0 : i32
    return %c0_i32, %arg1 : i32, i32
  }
  func.func @transform_6(%arg0: i32, %arg1: i32, %arg2: i32) -> (i32, i32) {
    %c0_i32 = arith.constant 0 : i32
    %c0_i32_0 = arith.constant 0 : i32
    return %c0_i32, %arg1 : i32, i32
  }
  func.func @transform_7(%arg0: i32, %arg1: i32, %arg2: i32) -> (i32, i32) {
    %c0_i32 = arith.constant 0 : i32
    return %arg0, %arg1 : i32, i32
  }
}

</mosaic_0001>

<bundles_post_ra>
// kernel: tpu_custom_call.1
= control target key start
LH: loop header
LB: loop body
LE: loop exit
PB: predicated region body
PF: predicated region fallthrough
CT: control target
= control target key end

     0   :  { %12 = vsyncpa [#allocation3], 0  ;;  %s626_s0 = inlined_call_operand.hbm [shape: bf16[16,128], index: 0, kind: input, shape index: {}]   ;;  %s627_s1 = inlined_call_operand.hbm [shape: bf16[128,128], index: 1, kind: input, shape index: {}]   ;;  %s628_s2 = inlined_call_operand.hbm [shape: bf16[128,128], index: 2, kind: input, shape index: {}]   ;;  %s629_s3 = inlined_call_operand.vmem [shape: f32[1,128], index: 3, kind: input, shape index: {}]   ;;  %s630_s4 = inlined_call_operand.vmem [shape: f32[1,128], index: 4, kind: input, shape index: {}]   ;;  %s631_s5 = inlined_call_operand.vmem [shape: f32[1,128], index: 5, kind: input, shape index: {}]   ;;  %s632_s6 = inlined_call_operand.vmem [shape: f32[1,128], index: 6, kind: input, shape index: {}]   ;;  %s633_s7 = inlined_call_operand.hbm [shape: f32[16,128], index: 7, kind: output, shape index: {}]  }
   0x1   :  { %13 = vsyncpa [#allocation6], 0 }
   0x2   :  { %14 = vsyncpa [#allocation4], 0  ;;  %s549_s24 = smov [#allocation5]   ;;  %s550_s26 = smov [#allocation2]  }
   0x3   :  { %s32_s25 = sshll.u32 %s549_s24, 4  ;;  %s20_s27 = sshll.u32 %s550_s26, 4  ;;  %s33_s25 = int_to_ptr.vmem [resolvable:$true] %s32_s25  ;;  %s21_s27 = int_to_ptr.vmem [resolvable:$true] %s20_s27 }
   0x4   :  { %s471_s28 = scalar_lea.vmem %s33_s25, 1024  ;;  %p476_p1 = scmp.lt.s32.totalorder %s33_s25, %s33_s25 }
   0x5   :  { %p472_p0 = scmp.ne.s32.totalorder %s33_s25, %s471_s28  ;;  %p477_p2 = scmp.lt.s32.totalorder %s471_s28, %s471_s28 }
   0x7   :  { %p478_p3 = por %p477_p2, %p476_p1 }
   0x9   :  { %p479_p4 = pnand %p478_p3, %p472_p0 }
   0xb   :  { %482 = shalt.err (!%p479_p4)
}
   0xc   :  { %s551_s29 = smov 64   ;;  %s552_s30 = smov 4  }
   0xd   :  { %38 = dma.hbm_to_vmem [thread:$0]  %s627_s1, 1024, %s33_s25, [#allocation6], %s551_s29, %s551_s29, %s552_s30  }
   0xe   :  { %s491_s10 = scalar_lea.vmem %s21_s27, 128  ;;  %p496_p6 = scmp.lt.s32.totalorder %s21_s27, %s21_s27 }
   0xf   :  { %p492_p5 = scmp.ne.s32.totalorder %s21_s27, %s491_s10  ;;  %p497_p7 = scmp.lt.s32.totalorder %s491_s10, %s491_s10 }
  0x11   :  { %p498_p8 = por %p497_p7, %p496_p6 }
  0x13   :  { %p499_p9 = pnand %p498_p8, %p492_p5 }
  0x15   :  { %502 = shalt.err (!%p499_p9)
}
  0x16   :  { %26 = dma.hbm_to_vmem [thread:$0]  %s626_s0, 128, %s21_s27, [#allocation3], %s551_s29, %s551_s29, %s552_s30  }
  0x17   :  { %s553_s13 = smov [#allocation7]  }
  0x18   :  { %s44_s14 = sshll.u32 %s553_s13, 4  ;;  %s45_s14 = int_to_ptr.vmem [resolvable:$true] %s44_s14 }
  0x19   :  { %s511_s15 = scalar_lea.vmem %s45_s14, 1024  ;;  %p516_p11 = scmp.lt.s32.totalorder %s45_s14, %s45_s14 }
  0x1a   :  { %p512_p10 = scmp.ne.s32.totalorder %s45_s14, %s511_s15  ;;  %p517_p12 = scmp.lt.s32.totalorder %s511_s15, %s511_s15 }
  0x1c   :  { %p518_p13 = por %p517_p12, %p516_p11 }
  0x1e   :  { %p519_p0 = pnand %p518_p13, %p512_p10 }
  0x20   :  { %522 = shalt.err (!%p519_p0)
}
  0x21   :  { %50 = dma.hbm_to_vmem [thread:$0]  %s628_s2, 1024, %s45_s14, [#allocation6], %s551_s29, %s551_s29, %s552_s30  }
  0x22   :  { %543 = dma.done.wait [#allocation3], 128  }
  0x23   :  { %544 = vsyncadd [#allocation3], 4294967168 }
  0x24   :  { %545 = dma.done.wait [#allocation6], 2048  }
  0x25   :  { %546 = vsyncadd [#allocation6], 4294965248  ;;  %v554_v0 = vmov 0.0   ;;  %vm555_vm0 = vmmov 0   ;;  %v445_v1 = vld [vmem:[#allocation7 + $0x38] sm:$0xff]   ;;  %v447_v3 = vld [vmem:[#allocation7 + $0x30] sm:$0xff]   ;;  %v331_v24 = vlaneseq }
  0x26   :  { %395 = vmatprep.subr.bf16.mxu0 %v554_v0  ;;  %415 = vmatprep.subr.bf16.mxu1 %v554_v0  ;;  %v446_v2 = vld [vmem:[#allocation5 + $0x38] sm:$0xff]   ;;  %v448_v4 = vld [vmem:[#allocation5 + $0x30] sm:$0xff]   ;;  %v449_v5 = vld [vmem:[#allocation7 + $0x28] sm:$0xff]  }
  0x27   :  { %411 = vmatprep.mubr.msk.bf16.mxu0 %vm555_vm0, %v554_v0  ;;  %431 = vmatprep.mubr.msk.bf16.mxu1 %vm555_vm0, %v554_v0  ;;  %v450_v6 = vld [vmem:[#allocation5 + $0x28] sm:$0xff]   ;;  %v451_v7 = vld [vmem:[#allocation7 + $0x20] sm:$0xff]   ;;  %v453_v9 = vld [vmem:[#allocation7 + $0x18] sm:$0xff]   ;;  %v332_v28 = vshrl.u32 %v331_v24, 7 }
  0x28   :  { %396 = vmatpush3.bf16.msra.mxu0 %v445_v1  ;;  %416 = vmatpush3.bf16.msra.mxu1 %v446_v2  ;;  %v452_v8 = vld [vmem:[#allocation5 + $0x20] sm:$0xff]   ;;  %v454_v10 = vld [vmem:[#allocation5 + $0x18] sm:$0xff]   ;;  %v455_v11 = vld [vmem:[#allocation7 + $0x10] sm:$0xff]  }
  0x29   :  { %397 = vmatprep.subr.bf16.mxu0 %v554_v0  ;;  %417 = vmatprep.subr.bf16.mxu1 %v554_v0  ;;  %v75_v12 = vld [vmem:[#allocation2] sm:$0xff]   ;;  %v456_v13 = vld [vmem:[#allocation5 + $0x10] sm:$0xff]   ;;  %v457_v16 = vld [vmem:[#allocation7 + $0x8] sm:$0xff]   ;;  %v333_v32 = vsub.s32 0, %v332_v28 }
  0x2a   :  { %v93_v14 = vunpack.c.l.bf16 %v75_v12  ;;  %v94_v15 = vunpack.c.h.bf16 %v75_v12  ;;  %v358_v17 = vld [vmem:[%s629_s3] ss:$0 sm:$0xff]  ;;  %v458_v18 = vld [vmem:[#allocation5 + $0x8] sm:$0xff]   ;;  %v459_v21 = vld [vmem:[#allocation7] sm:$0xff]  }
  0x2b   :  { %v460_v22 = vld [vmem:[#allocation5] sm:$0xff]   ;;  %v326_v25 = vld [vmem:[%s632_s6] sm:$0x1] }
  0x2c   :  { %398 = vmatpush3.bf16.msra.mxu0 %v447_v3  ;;  %418 = vmatpush3.bf16.msra.mxu1 %v448_v4  ;;  %v102_v19 = vmul.f32 %v358_v17, %v93_v14  ;;  %v103_v20 = vmul.f32 %v358_v17, %v94_v15  ;;  %v327_v26 = vld [vmem:[%s630_s4] sm:$0x1] }
  0x2d   :  { %399 = vmatprep.subr.bf16.mxu0 %v554_v0  ;;  %419 = vmatprep.subr.bf16.mxu1 %v554_v0  ;;  %v328_v27 = vmul.f32 %v327_v26, %v326_v25  ;;  %v325_v29 = vld [vmem:[%s631_s5] sm:$0x1]  ;;  %s556_s5 = smov [#allocation8]  }
  0x2e   :  { %v104_v23 = vpack.c.bf16 %v103_v20, %v102_v19  ;;  %v367_v30 = vld [vmem:[%s630_s4] ss:$0 sm:$0xff]  ;;  %s345_s6 = sshll.u32 %s556_s5, 4  ;;  %s346_s6 = int_to_ptr.vmem [resolvable:$true] %s345_s6 }
  0x2f   :  { %v329_v31 = vadd.f32 %v328_v27, %v325_v29  ;;  %s523_s4 = scalar_lea.vmem %s346_s6, 256  ;;  %p528_p2 = scmp.lt.s32.totalorder %s346_s6, %s346_s6 }
  0x30   :  { %400 = vmatpush3.bf16.msra.mxu0 %v449_v5  ;;  %420 = vmatpush3.bf16.msra.mxu1 %v450_v6  ;;  %p524_p1 = scmp.ne.s32.totalorder %s346_s6, %s523_s4  ;;  %p529_p3 = scmp.lt.s32.totalorder %s523_s4, %s523_s4 }
  0x31   :  { %401 = vmatprep.subr.bf16.mxu0 %v554_v0  ;;  %421 = vmatprep.subr.bf16.mxu1 %v554_v0  ;;  %v334_v39 = vrot.slane %v329_v31, %v333_v32 }
  0x32   :  { %p530_p4 = por %p529_p3, %p528_p2 }
  0x34   :  { %402 = vmatpush3.bf16.msra.mxu0 %v451_v7  ;;  %422 = vmatpush3.bf16.msra.mxu1 %v452_v8  ;;  %p531_p5 = pnand %p530_p4, %p524_p1 }
  0x35   :  { %403 = vmatprep.subr.bf16.mxu0 %v554_v0  ;;  %423 = vmatprep.subr.bf16.mxu1 %v554_v0 }
  0x38   :  { %404 = vmatpush3.bf16.msra.mxu0 %v453_v9  ;;  %424 = vmatpush3.bf16.msra.mxu1 %v454_v10 }
  0x39   :  { %405 = vmatprep.subr.bf16.mxu0 %v554_v0  ;;  %425 = vmatprep.subr.bf16.mxu1 %v554_v0 }
  0x3c   :  { %406 = vmatpush3.bf16.msra.mxu0 %v455_v11  ;;  %426 = vmatpush3.bf16.msra.mxu1 %v456_v13 }
  0x3d   :  { %407 = vmatprep.subr.bf16.mxu0 %v554_v0  ;;  %427 = vmatprep.subr.bf16.mxu1 %v554_v0 }
  0x40   :  { %408 = vmatpush3.bf16.msra.mxu0 %v457_v16  ;;  %428 = vmatpush3.bf16.msra.mxu1 %v458_v18 }
  0x41   :  { %409 = vmatprep.subr.bf16.mxu0 %v554_v0  ;;  %429 = vmatprep.subr.bf16.mxu1 %v554_v0 }
  0x44   :  { %410 = vmatpush3.bf16.msra.mxu0 %v459_v21  ;;  %430 = vmatpush3.bf16.msra.mxu1 %v460_v22 }
  0x47   :  { %412 = vmatmul.mubr.bf16.vlgmr.msra.gmra.mxu0 %v104_v23  ;;  %432 = vmatmul.mubr.bf16.vlgmr.msra.gmra.mxu1 %v75_v12 }
 0x107   :  { %v203_v33 = vpop.f32.mrf.mxu0  ;;  %v309_v35 = vpop.f32.mrf.mxu1 }
 0x108   :  { %v219_v34 = vmul.f32 %v367_v30, %v203_v33 }
 0x109   :  { %v413_v36 = vpop.f32.mrf.mxu0  ;;  %v433_v38 = vpop.f32.mrf.mxu1 }
 0x10a   :  { %v310_v37 = vadd.f32 %v309_v35, %v219_v34 }
 0x10b   :  { %v206_v40 = vpop.f32.mrf.mxu0  ;;  %v312_v42 = vpop.f32.mrf.mxu1 }
 0x10c   :  { %v220_v41 = vmul.f32 %v367_v30, %v206_v40  ;;  %v336_v46 = vadd.f32 %v334_v39, %v310_v37 }
 0x10d   :  { %v414_v43 = vpop.f32.mrf.mxu0  ;;  %v434_v45 = vpop.f32.mrf.mxu1 }
 0x10e   :  { %v313_v44 = vadd.f32 %v312_v42, %v220_v41  ;;  %338 = vst [vmem:[#allocation8] sm:$0xff] %v336_v46 }
 0x110   :  { %v337_v47 = vadd.f32 %v334_v39, %v313_v44 }
 0x112   :  { %339 = vst [vmem:[#allocation8 + $0x8] sm:$0xff] %v337_v47 }
 0x113   :  { %534 = shalt.err (!%p531_p5)
}
 0x114   :  { %s557_s24 = smov 128   ;;  %s558_s25 = smov 8  }
 0x115   :  { %351 = dma.vmem_to_hbm [thread:$0]  %s346_s6, 256, %s633_s7, [#allocation4], %s557_s24, %s557_s24, %s558_s25  }
 0x116   :  { %547 = dma.done.wait [#allocation4], 256  }
 0x117   :  { %548 = vsyncadd [#allocation4], 4294967040 }
 0x118   :  { %355 = vsyncpa [#allocation3], 1 }
 0x119   :  { %356 = vsyncpa [#allocation6], 1 }
 0x11a   :  { %357 = vsyncpa [#allocation4], 1 }

</bundles_post_ra>
